<compile_context>
chip_gen: v7x
topology: tpu7x:2x2x1
jax: 0.10.0
libtpu: 0.0.40
codegen_flags: <defaults>
</compile_context>

<pallas_src>
import functools

import jax
import jax.numpy as jnp
from jax.experimental import pallas as pl
from jax.experimental.pallas import tpu as pltpu

_MIB = 1024 * 1024
_W_RESIDENT_BYTES = 16 * _MIB        # double-buffered weight budget for path A
_RESIDENT_VMEM_BUDGET = 40 * _MIB    # total tile footprint budget for path A
_VMEM_CAP_BYTES = 48 * _MIB          # safe on v7x (64 MiB physical per TC)


def _round_up(x, m):
    return ((x + m - 1) // m) * m


def _cdiv(a, b):
    return -(-a // b)


def _sublane_multiple(dtype):
    # Minimum second-minor block multiple for the packed vreg layout.
    return {4: 8, 2: 16, 1: 32}.get(jnp.dtype(dtype).itemsize, 8)


def _matmul_no_k_grid_kernel(x_ref, w_ref, o_ref):
    """Whole contraction in one dot: no accumulator scratch, direct store."""
    o_ref[...] = jnp.dot(
        x_ref[...], w_ref[...], preferred_element_type=jnp.float32
    ).astype(o_ref.dtype)


def _matmul_k_grid_kernel(x_ref, w_ref, o_ref, acc_ref):
    """One (tm, tn) output tile accumulated over the K grid axis."""
    k = pl.program_id(2)

    @pl.when(k == 0)
    def _():
        acc_ref[...] = jnp.zeros_like(acc_ref)

    acc_ref[...] += jnp.dot(
        x_ref[...], w_ref[...], preferred_element_type=jnp.float32
    )

    @pl.when(k == pl.num_programs(2) - 1)
    def _():
        o_ref[...] = acc_ref[...].astype(o_ref.dtype)


@functools.partial(
    jax.jit, static_argnames=("tm_max", "tn_max", "tk_max", "compute_dtype")
)
def mlgelm_encoder_block_forward(
    x, decoder_weight, *, tm_max=512, tn_max=512, tk_max=512, compute_dtype=None
):
    """Pallas implementation of MLGELMEncoderBlock.forward.

    x:              (..., in_features)
    decoder_weight: (in_features, out_features)   -- PyTorch layout
    compute_dtype:  optional MXU input dtype (e.g. jnp.bfloat16) for the
                    bf16-MXU win on v5e/v6e/v7x; accumulation stays f32.
    returns:        (..., out_features) in x.dtype
    """
    k_dim, n_dim = decoder_weight.shape
    lead_shape = x.shape[:-1]
    assert x.shape[-1] == k_dim
    out_dtype = x.dtype

    x2 = x.reshape(-1, k_dim)
    m = x2.shape[0]
    if m == 0:
        return jnp.zeros((*lead_shape, n_dim), dtype=out_dtype)

    if compute_dtype is not None:
        x2 = x2.astype(compute_dtype)
        decoder_weight = decoder_weight.astype(compute_dtype)
    in_itemsize = jnp.dtype(x2.dtype).itemsize
    out_itemsize = jnp.dtype(out_dtype).itemsize
    sub = _sublane_multiple(x2.dtype)

    # ------------- Path A: weight fully VMEM-resident, grid over M only -----
    w_bytes = 2 * k_dim * n_dim * in_itemsize          # double-buffer budget
    tm_a = min(tm_max, _round_up(m, sub))
    if m >= 256 and _cdiv(m, tm_a) == 1:
        # Expose >=2 M tiles so a second TensorCore (v7x) has work.
        tm_a = min(tm_max, _round_up(_cdiv(m, 2), sub))
    vmem_a = (
        2 * tm_a * k_dim * in_itemsize
        + w_bytes
        + 2 * tm_a * n_dim * out_itemsize
    )

    if w_bytes <= _W_RESIDENT_BYTES and vmem_a <= _RESIDENT_VMEM_BUDGET:
        grid_m = _cdiv(m, tm_a)
        out = pl.pallas_call(
            _matmul_no_k_grid_kernel,
            out_shape=jax.ShapeDtypeStruct((m, n_dim), out_dtype),
            grid_spec=pltpu.PrefetchScalarGridSpec(
                num_scalar_prefetch=0,
                grid=(grid_m,),
                in_specs=[
                    # x tile depends only on the M grid index.
                    pl.BlockSpec((tm_a, k_dim), lambda i: (i, 0)),
                    # Full weight, constant index_map -> fetched once, reused.
                    pl.BlockSpec((k_dim, n_dim), lambda i: (0, 0)),
                ],
                out_specs=pl.BlockSpec((tm_a, n_dim), lambda i: (i, 0)),
            ),
            compiler_params=pltpu.CompilerParams(
                dimension_semantics=("parallel",),
                vmem_limit_bytes=int(
                    min(max(2 * vmem_a, 16 * _MIB), _VMEM_CAP_BYTES)
                ),
            ),
            cost_estimate=pl.CostEstimate(
                flops=2 * m * k_dim * n_dim,
                transcendentals=0,
                bytes_accessed=(
                    m * k_dim * in_itemsize
                    + k_dim * n_dim * in_itemsize
                    + m * n_dim * out_itemsize
                ),
            ),
        )(x2, decoder_weight)
        return out.reshape(*lead_shape, n_dim)

    # ------------- Path B: tiled (M, N, K) grid ------------------------------
    k128 = _round_up(k_dim, 128)
    n128 = _round_up(n_dim, 128)

    # tk / tn: multiples of 128 that divide the padded extents (<= the caps).
    tk = min(tk_max, k128)
    while k128 % tk:
        tk -= 128
    tn = min(tn_max, n128)
    while n128 % tn:
        tn -= 128
    grid_n = n128 // tn
    grid_k = k128 // tk

    tm = min(tm_max, _round_up(m, sub))
    if m >= 256 and _cdiv(m, tm) == 1 and grid_n == 1:
        tm = min(tm_max, _round_up(_cdiv(m, 2), sub))   # keep 2 parallel tiles
    grid_m = _cdiv(m, tm)

    # Zero-pad only what exactness requires:
    #   * x along K (zeros add nothing to the reduction),
    #   * the small weight along K and N.
    # M is never padded: partial last M blocks rely on masked stores.
    xp = x2 if k128 == k_dim else jnp.pad(x2, ((0, 0), (0, k128 - k_dim)))
    wp = decoder_weight
    if (k128, n128) != decoder_weight.shape:
        wp = jnp.pad(
            decoder_weight, ((0, k128 - k_dim), (0, n128 - n_dim))
        )

    vmem_b = (
        2 * tm * tk * in_itemsize
        + 2 * tk * tn * in_itemsize
        + 2 * tm * tn * out_itemsize
        + tm * tn * 4                              # f32 accumulator scratch
    )
    vmem_limit = int(min(max(2 * vmem_b, 16 * _MIB), _VMEM_CAP_BYTES))
    cost = pl.CostEstimate(
        flops=2 * m * k128 * n128,
        transcendentals=0,
        bytes_accessed=(
            grid_n * m * k128 * in_itemsize        # x re-read once per N tile
            + grid_m * k128 * n128 * in_itemsize   # W re-read once per M tile
            + m * n128 * out_itemsize
        ),
    )

    if grid_k == 1:
        # Single K step: drop the accumulator scratch and the K grid axis.
        out_padded = pl.pallas_call(
            _matmul_no_k_grid_kernel,
            out_shape=jax.ShapeDtypeStruct((m, n128), out_dtype),
            grid_spec=pltpu.PrefetchScalarGridSpec(
                num_scalar_prefetch=0,
                grid=(grid_m, grid_n),
                in_specs=[
                    pl.BlockSpec((tm, tk), lambda i, j: (i, 0)),
                    pl.BlockSpec((tk, tn), lambda i, j: (0, j)),
                ],
                out_specs=pl.BlockSpec((tm, tn), lambda i, j: (i, j)),
            ),
            compiler_params=pltpu.CompilerParams(
                dimension_semantics=("parallel", "parallel"),
                vmem_limit_bytes=vmem_limit,
            ),
            cost_estimate=cost,
        )(xp, wp)
    else:
        out_padded = pl.pallas_call(
            _matmul_k_grid_kernel,
            out_shape=jax.ShapeDtypeStruct((m, n128), out_dtype),
            grid_spec=pltpu.PrefetchScalarGridSpec(
                num_scalar_prefetch=0,
                grid=(grid_m, grid_n, grid_k),
                in_specs=[
                    pl.BlockSpec((tm, tk), lambda i, j, k: (i, k)),
                    pl.BlockSpec((tk, tn), lambda i, j, k: (k, j)),
                ],
                # Same output tile across the K axis -> VMEM-resident acc.
                out_specs=pl.BlockSpec((tm, tn), lambda i, j, k: (i, j)),
                scratch_shapes=[pltpu.VMEM((tm, tn), jnp.float32)],
            ),
            compiler_params=pltpu.CompilerParams(
                dimension_semantics=("parallel", "parallel", "arbitrary"),
                vmem_limit_bytes=vmem_limit,
            ),
            cost_estimate=cost,
        )(xp, wp)

    out = out_padded if n128 == n_dim else out_padded[:, :n_dim]
    return out.reshape(*lead_shape, n_dim)


if __name__ == "__main__":
    key = jax.random.PRNGKey(0)
    k_x, k_w, k_x2, k_w2 = jax.random.split(key, 4)

    # Small shapes implied by the module: batch=8, in_features=32, out_features=16.
    # __init__ zero-initializes decoder_weight; use a deterministic random
    # weight so the result is non-trivial (encoder_weight/bias are unused in
    # forward()).
    batch, in_features, out_features = 8, 32, 16
    x = jax.random.normal(k_x, (batch, in_features), dtype=jnp.float32)
    decoder_weight = jax.random.normal(
        k_w, (in_features, out_features), dtype=jnp.float32
    )

    out = jax.block_until_ready(mlgelm_encoder_block_forward(x, decoder_weight))
    ref = x @ decoder_weight
    assert out.shape == (batch, out_features)
    assert jnp.allclose(out, ref, atol=1e-5, rtol=1e-5)

    # A second (still modest) problem exercising the tiled (M, N, K) path:
    # partial last M block, K-axis accumulation, non-128-multiple N.
    m2, k2, n2 = 600, 2048, 1536
    x_big = jax.random.normal(k_x2, (m2, k2), dtype=jnp.float32)
    w_big = jax.random.normal(k_w2, (k2, n2), dtype=jnp.float32)
    out_big = jax.block_until_ready(mlgelm_encoder_block_forward(x_big, w_big))
    ref_big = x_big @ w_big
    assert out_big.shape == (m2, n2)
    assert jnp.allclose(out_big, ref_big, atol=1e-3, rtol=1e-3)

    print("KERNEL_OK")
</pallas_src>

<mosaic_0001>
module attributes {stable_mosaic.version = 11 : i64} {
  func.func @_matmul_no_k_grid_kernel(%arg0: i32, %arg1: memref<8x32xf32, #tpu.memory_space<vmem>>, %arg2: memref<32x16xf32, #tpu.memory_space<vmem>>, %arg3: memref<8x16xf32, #tpu.memory_space<vmem>>) attributes {dimension_semantics = [#tpu.dimension_semantics<parallel>], iteration_bounds = array<i64: 1>, scalar_prefetch = 0 : i64, scratch_operands = 0 : i64, tpu.core_type = #tpu.core_type<tc>, window_params = [{transform_indices = @transform_0, window_bounds = array<i64: 8, 32>}, {pipeline_mode = #tpu.pipeline_mode<synchronous>, transform_indices = @transform_1, window_bounds = array<i64: 32, 16>}, {transform_indices = @transform_2, window_bounds = array<i64: 8, 16>}]} {
    %c0 = arith.constant 0 : index
    %c0_0 = arith.constant 0 : index
    %0 = vector.load %arg1[%c0, %c0_0] : memref<8x32xf32, #tpu.memory_space<vmem>>, vector<8x32xf32>
    %c0_1 = arith.constant 0 : index
    %c0_2 = arith.constant 0 : index
    %1 = vector.load %arg2[%c0_1, %c0_2] : memref<32x16xf32, #tpu.memory_space<vmem>>, vector<32x16xf32>
    %cst = arith.constant dense<0.000000e+00> : vector<8x16xf32>
    %2 = tpu.matmul %0, %1, %cst {dimension_numbers = #tpu.dot_dimension_numbers<[1], [0], [0], [1], [0, 0, 1, 1], [], []>} : vector<8x32xf32>, vector<32x16xf32>, vector<8x16xf32> -> vector<8x16xf32>
    %c0_3 = arith.constant 0 : index
    %c0_4 = arith.constant 0 : index
    %3 = vector.load %arg3[%c0_3, %c0_4] : memref<8x16xf32, #tpu.memory_space<vmem>>, vector<8x16xf32>
    tpu.vector_store %arg3[%c0_3, %c0_4], %2 {strides = array<i32>} : memref<8x16xf32, #tpu.memory_space<vmem>>, vector<8x16xf32>,
    return
  }
  func.func @transform_0(%arg0: i32) -> (i32, i32) {
    %c0_i32 = arith.constant 0 : i32
    %c0_i32_0 = arith.constant 0 : i32
    return %arg0, %c0_i32 : i32, i32
  }
  func.func @transform_1(%arg0: i32) -> (i32, i32) {
    %c0_i32 = arith.constant 0 : i32
    %c0_i32_0 = arith.constant 0 : i32
    %c0_i32_1 = arith.constant 0 : i32
    return %c0_i32, %c0_i32_0 : i32, i32
  }
  func.func @transform_2(%arg0: i32) -> (i32, i32) {
    %c0_i32 = arith.constant 0 : i32
    %c0_i32_0 = arith.constant 0 : i32
    return %arg0, %c0_i32 : i32, i32
  }
}

</mosaic_0001>

<bundles_post_ra>
// kernel: mlgelm_encoder_block_forward.1
= control target key start
LH: loop header
LB: loop body
LE: loop exit
PB: predicated region body
PF: predicated region fallthrough
CT: control target
= control target key end

     0   :  { %v158_v3 = vmov 0.0|0.0   ;;  %vm159_vm0 = vmmov 0   ;;  %v160_v6 = vmov 0.0   ;;  %s204_s0 = inlined_call_operand.vmem [shape: f32[8,32], index: 0, kind: input, shape index: {}]   ;;  %s205_s1 = inlined_call_operand.vmem [shape: f32[32,16], index: 1, kind: input, shape index: {}]   ;;  %s206_s2 = inlined_call_operand.hbm [shape: f32[8,16], index: 2, kind: output, shape index: {}]  }
   0x1   :  { %v13_v0 = vld [vmem:[%s205_s1] sm:$0xff]  ;;  %v14_v1 = vld [vmem:[%s205_s1 + $0x8] sm:$0xff]  ;;  %v15_v2 = vld [vmem:[%s205_s1 + $0x10] sm:$0xff]  ;;  %124 = vmatprep.subr.bf16.mxu0 %v158_v3  ;;  %121 = vmatprep.mubr.msk.f32.mxu0 %vm159_vm0, %v160_v6 }
   0x2   :  { %v125_v4 = vpack.c.bf16 %v14_v1, %v13_v0  ;;  %v16_v5 = vld [vmem:[%s205_s1 + $0x18] sm:$0xff] }
   0x3   :  { %7 = vsyncpa [#allocation3], 0  ;;  %v128_v7 = vpack.c.bf16 %v16_v5, %v15_v2  ;;  %v12_v8 = vld [vmem:[%s204_s0] sm:$0xff]  ;;  %vm17_vm1 = vcmask 261120   ;;  %s161_s19 = smov [#allocation2]   ;;  %vm91_vm2 = vcmask 130048  }
   0x4   :  { %126 = vmatpush3.bf16.msra.mxu0 %v125_v4  ;;  %s99_s20 = sshll.u32 %s161_s19, 4  ;;  %s100_s20 = int_to_ptr.vmem [resolvable:$true] %s99_s20 }
   0x5   :  { %127 = vmatprep.subr.bf16.mxu0 %v158_v3  ;;  %s134_s1 = scalar_lea.vmem %s100_s20, 128  ;;  %p139_p1 = scmp.lt.s32.totalorder %s100_s20, %s100_s20 }
   0x6   :  { %p135_p0 = scmp.ne.s32.totalorder %s100_s20, %s134_s1  ;;  %p140_p2 = scmp.lt.s32.totalorder %s134_s1, %s134_s1 }
   0x8   :  { %129 = vmatpush3.bf16.msra.mxu0 %v128_v7  ;;  %p141_p3 = por %p140_p2, %p139_p1 }
   0xa   :  { %p142_p4 = pnand %p141_p3, %p135_p0 }
   0xb   :  { %122 = vmatmul.mubr.msk.f32.vlgmr.msra.gmra.mrb[0].mxu0 %vm17_vm1, %v12_v8 }
  0xde   :  { %v87_v9 = vpop.f32.mrb[0].mxu0 }
  0xdf   :  { %92 = vst.msk [vmem:[#allocation2] sm:$0xff] %vm91_vm2, %v87_v9  ;;  %v123_v10 = vpop.f32.mrb[1].mxu0 }
  0xe0   :  { %145 = shalt.err (!%p142_p4)
}
  0xe1   :  { %s146_s0 = scalar_lea.hbm %s206_s2, 128 }
  0xe2   :  { %p147_p5 = scmp.ne.s32.totalorder %s206_s2, %s146_s0  ;;  %p150_p6 = scmp.lt.u32.totalorder %s146_s0, %s206_s2 }
  0xe4   :  { %p152_p7 = pnand %p150_p6, %p147_p5 }
  0xe6   :  { %155 = shalt.err (!%p152_p7)
}
  0xe7   :  { %102 = dma.vmem_to_hbm [thread:$0]  %s100_s20, 128, %s206_s2, [#allocation3]  }
  0xe8   :  { %156 = dma.done.wait [#allocation3], 128  }
  0xe9   :  { %157 = vsyncadd [#allocation3], 4294967168 }
  0xea   :  { %106 = vsyncpa [#allocation3], 1 }

</bundles_post_ra>
